<compile_context>
chip_gen: v6e
topology: v6e:2x2x1
jax: 0.10.0
libtpu: 0.0.40
codegen_flags: <defaults>
</compile_context>

<pallas_src>
import functools
from types import SimpleNamespace

import jax
import jax.numpy as jnp
from jax.experimental import pallas as pl
from jax.experimental.pallas import tpu as pltpu


# ---------------------------------------------------------------------------
# Generation-aware VMEM budgeting
# ---------------------------------------------------------------------------
def _vmem_capacity_bytes():
    """Per-TensorCore VMEM capacity (v5e/v6e ~128 MiB, v7x 64 MiB); falls back
    to the conservative v7x figure if the query is unavailable."""
    try:
        info = pltpu.get_tpu_info()
        cap = getattr(info, "vmem_capacity_bytes", None)
        if cap:
            return int(cap)
    except Exception:
        pass
    return 64 << 20


def _pick_b_tile(B, row_bytes, big_blocks, vmem_budget):
    """Divisor search for the batch tile.

    b_tile is the second-to-last dim of the (N, B, F) modulation blocks, so it
    must be a multiple of 8 or equal to B (the (8,128) BlockSpec rule).  Pick
    the largest valid divisor whose double-buffered resident working set fits
    the budget; if that single tile would cover all of B, prefer >= 2 tiles
    (so the "parallel" B-tile axis can shard across v7x's two TensorCores) as
    long as each block stays >= ~512 KiB (amortizes ~0.35 us per grid step).
    """
    divs = sorted(d for d in range(1, B + 1)
                  if B % d == 0 and (d % 8 == 0 or d == B))
    per_tile = 2 * big_blocks * row_bytes
    fits = [d for d in divs if d * per_tile <= vmem_budget] or [divs[0]]
    best = max(fits)
    if B // best < 2:
        split = [d for d in fits if B // d >= 2 and d * row_bytes >= (512 << 10)]
        if split:
            best = max(split)
    return best


# ---------------------------------------------------------------------------
# Kernel 1: net_frame.forward_multiframe + FiLM modulation params, all N mixes
#   grid = (N, S_chunks); S = Tf*H*W is only chunked for multi-MB slabs, so
#   small inputs use exactly one grid step per mix.  Both linear layers run
#   on the MXU; the scale/shift heads are fused into one (K, 2F) matmul.
# ---------------------------------------------------------------------------
def _frame_mod_kernel(frames_ref, fw_ref, fb_ref, wcat_ref, mod_ref, pool_acc,
                      *, inv_s):
    s = pl.program_id(1)

    @pl.when(s == 0)
    def _():
        pool_acc[...] = jnp.zeros_like(pool_acc)

    # partial spatio-temporal sum over this S chunk -> (B, C)
    pool_acc[...] += jnp.sum(frames_ref[0], axis=-1)

    @pl.when(s == pl.num_programs(1) - 1)
    def _():
        pooled = pool_acc[...] * inv_s                                    # avg pool
        feat = jnp.maximum(
            jnp.dot(pooled, fw_ref[...], preferred_element_type=jnp.float32)
            + fb_ref[...], 0.0)                                           # (B, K) ReLU
        # single fused matmul emitting the concatenated FiLM (scale | shift)
        mod_ref[0] = jnp.dot(feat, wcat_ref[...],
                             preferred_element_type=jnp.float32)          # (B, 2F)


def _pick_s_chunk(s_total, row_bytes, min_chunk_bytes=1 << 20,
                  max_chunk_bytes=8 << 20):
    """Only chunk the flattened video axis when a single per-mix slab would be
    large; chunks stay 128-aligned and >= min_chunk_bytes so grid-step
    overhead is negligible.  Small inputs use exactly one step per mix."""
    if s_total * row_bytes <= max_chunk_bytes or s_total % 128 != 0:
        return s_total
    chunk = s_total
    while (chunk % 2 == 0 and (chunk // 2) % 128 == 0
           and (chunk // 2) * row_bytes >= min_chunk_bytes
           and chunk * row_bytes > max_chunk_bytes):
        chunk //= 2
    return chunk


def frame_modulation(frames_all, frame_w, frame_b, sound_wcat):
    """Returns the concatenated per-mix FiLM modulation (N, B, 2F)."""
    N, B, C, S = frames_all.shape
    K = frame_w.shape[1]
    F2 = sound_wcat.shape[1]
    s_chunk = _pick_s_chunk(S, B * C * 4)
    n_s = S // s_chunk

    kernel = functools.partial(_frame_mod_kernel, inv_s=1.0 / S)
    return pl.pallas_call(
        kernel,
        grid=(N, n_s),
        in_specs=[
            pl.BlockSpec((1, B, C, s_chunk), lambda n, s: (n, 0, 0, s)),
            pl.BlockSpec((C, K), lambda n, s: (0, 0)),
            pl.BlockSpec((1, K), lambda n, s: (0, 0)),
            pl.BlockSpec((K, F2), lambda n, s: (0, 0)),
        ],
        out_specs=pl.BlockSpec((1, B, F2), lambda n, s: (n, 0, 0)),
        out_shape=jax.ShapeDtypeStruct((N, B, F2), jnp.float32),
        scratch_shapes=[pltpu.VMEM((B, C), jnp.float32)],
        compiler_params=pltpu.CompilerParams(
            dimension_semantics=("parallel", "arbitrary")),
    )(frames_all, frame_w, frame_b, sound_wcat)


# ---------------------------------------------------------------------------
# Kernel 2: fused spectral pipeline
#   (mag_mix + eps, loss weight, log-mag, gt mask, FiLM cycles, sigmoid pred,
#    logit-space weighted BCE / weighted L1 partial sums)
#   grid = (B_tiles, N) with N innermost -> shared blocks VMEM-resident;
#   n-invariant EUP work (log / log1p / 1/mm) is cached once per B-tile.
# ---------------------------------------------------------------------------
def _fused_spec_kernel(magmix_ref, mags_ref, scale_ref, shift_ref, *refs,
                       cycs, binary_mask, weighted_loss):
    if weighted_loss:
        pred_ref, gt_ref, mm_eps_ref, weight_ref, loss_ref = refs[:5]
        scr = refs[5:]
    else:
        pred_ref, gt_ref, mm_eps_ref, loss_ref = refs[:4]
        weight_ref = None
        scr = refs[4:]
    logmm_ref = scr[0]
    invmm_ref = None if binary_mask else scr[1]

    n = pl.program_id(1)
    mm = magmix_ref[...] + 1e-10            # (Bt, F, T)  mag_mix + eps (cheap VALU)

    # n-invariant transcendental work: computed once per B-tile (n == 0) and
    # cached in the resident output blocks (their index_maps ignore n, so they
    # stay in VMEM across the inner mix axis) plus a VMEM scratch for log(mm).
    @pl.when(n == 0)
    def _():
        mm_eps_ref[...] = mm
        logmm_ref[...] = jnp.log(mm)
        if weighted_loss:
            weight_ref[...] = jnp.clip(jnp.log(1.0 + mm), 0.001, 10.0)
        if not binary_mask:
            invmm_ref[...] = 1.0 / mm

    log_mm = logmm_ref[...]
    if weighted_loss:
        w = weight_ref[...]

    # ground-truth mask for this mix
    mg = mags_ref[0]
    if binary_mask:
        gt = (mg > 0.5 * mm).astype(jnp.float32)
    else:
        gt = jnp.clip(mg * invmm_ref[...], 0.0, 5.0)
    gt_ref[0] = gt

    # net_sound.forward_test_stage: FiLM refinement cycles.  The (B, F) ->
    # (B, F, T) broadcasts of scale/shift are hoisted out of the cycle loop.
    scale_b = jnp.broadcast_to(scale_ref[0][:, :, None], log_mm.shape)
    shift_b = jnp.broadcast_to(shift_ref[0][:, :, None], log_mm.shape)
    x = log_mm
    for _ in range(cycs):                   # static cycs_in_test cycles
        x = jnp.tanh(scale_b * x + shift_b)

    # sigmoid (pred mask) and logit-space softplus BCE share one exp(-|x|);
    # the reciprocal uses the EUP vrcp slot.
    e = jnp.exp(-jnp.abs(x))
    r = pl.reciprocal(1.0 + e, approx=True)
    pred = jnp.where(x >= 0, r, e * r)      # == sigmoid(x)
    pred_ref[0] = pred

    if binary_mask:
        per_elem = jnp.maximum(x, 0.0) + jnp.log(1.0 + e) - gt * x   # softplus - gt*x
    else:
        per_elem = jnp.abs(pred - gt)       # weighted L1
    if weighted_loss:
        per_elem = per_elem * w
    part = jnp.full(loss_ref.shape, jnp.sum(per_elem), jnp.float32)

    # loss accumulates across the inner mix axis into one resident block per
    # B-tile (index_map ignores n) -> a single small HBM writeback per tile;
    # different B-tiles own different blocks, so the tile axis stays parallel.
    @pl.when(n == 0)
    def _():
        loss_ref[...] = part

    @pl.when(n > 0)
    def _():
        loss_ref[...] += part


def fused_spectral(mag_mix, mags_all, scale, shift, *,
                   cycs, binary_mask, weighted_loss):
    B, Fq, T = mag_mix.shape
    N = mags_all.shape[0]
    row_bytes = Fq * T * 4                     # one batch row of one f32 block

    # resident / double-buffered full-size blocks per batch row:
    #   inputs: mag_mix, mags; outputs: pred, gt, mm_eps (+ weight);
    #   scratch: log_mm (+ 1/mm for the ratio-mask path)
    n_big = 2 + (4 if weighted_loss else 3) + (1 if binary_mask else 2)
    cap = _vmem_capacity_bytes()
    b_tile = _pick_b_tile(B, row_bytes, n_big, int(0.7 * cap))
    n_bt = B // b_tile

    kernel = functools.partial(_fused_spec_kernel, cycs=cycs,
                               binary_mask=binary_mask,
                               weighted_loss=weighted_loss)

    spec_shared = pl.BlockSpec((b_tile, Fq, T), lambda bt, n: (bt, 0, 0))
    spec_mix = pl.BlockSpec((1, b_tile, Fq, T), lambda bt, n: (n, bt, 0, 0))
    spec_mod = pl.BlockSpec((1, b_tile, Fq), lambda bt, n: (n, bt, 0))
    spec_loss = pl.BlockSpec((1, 8, 128), lambda bt, n: (bt, 0, 0))

    sds_shared = jax.ShapeDtypeStruct((B, Fq, T), jnp.float32)
    sds_mix = jax.ShapeDtypeStruct((N, B, Fq, T), jnp.float32)
    sds_loss = jax.ShapeDtypeStruct((n_bt, 8, 128), jnp.float32)

    out_specs = [spec_mix, spec_mix, spec_shared]
    out_shape = [sds_mix, sds_mix, sds_shared]
    if weighted_loss:
        out_specs.append(spec_shared)
        out_shape.append(sds_shared)
    out_specs.append(spec_loss)
    out_shape.append(sds_loss)

    scratch = [pltpu.VMEM((b_tile, Fq, T), jnp.float32)]          # log|mag_mix|
    if not binary_mask:
        scratch.append(pltpu.VMEM((b_tile, Fq, T), jnp.float32))  # 1 / mag_mix

    # VMEM budget sized from the resident blocks (+ headroom for the small
    # modulation / loss blocks), clamped below the per-TensorCore capacity.
    vmem_need = 2 * n_big * b_tile * row_bytes + (1 << 20)
    vmem_limit = int(min(max(2 * vmem_need, 16 << 20), int(0.8 * cap)))

    return pl.pallas_call(
        kernel,
        grid=(n_bt, N),                       # N innermost: shared blocks resident
        in_specs=[spec_shared, spec_mix, spec_mod, spec_mod],
        out_specs=tuple(out_specs),
        out_shape=tuple(out_shape),
        scratch_shapes=scratch,
        compiler_params=pltpu.CompilerParams(
            dimension_semantics=("parallel", "arbitrary"),
            vmem_limit_bytes=vmem_limit),
    )(mag_mix, mags_all, scale, shift)


# ---------------------------------------------------------------------------
# NetWrapper.forward equivalent
# ---------------------------------------------------------------------------
def net_wrapper_forward(batch_data, params, args):
    mag_mix = batch_data['mag_mix']     # (B, 1, F, T)
    mags = batch_data['mags']           # list of N (B, 1, F, T)
    frames = batch_data['frames']       # list of N (B, 3, Tf, H, W)
    N = args.num_mix
    B, _, Fq, T = mag_mix.shape

    # TODO(synk): args.log_freq path (warpgrid + F.grid_sample frequency warp)
    # has no clean Pallas equivalent here; this script runs the log_freq=False path.
    assert not args.log_freq
    assert args.output_activation == 'sigmoid'

    mm = mag_mix[:, 0]                                               # (B, F, T)
    mags_all = jnp.stack([m[:, 0] for m in mags], axis=0)            # (N, B, F, T)
    frames_all = jnp.stack(
        [f.reshape(B, f.shape[1], -1) for f in frames], axis=0)      # (N, B, 3, S)

    # per-mix FiLM modulation from the video frames; the two output heads are
    # fused into one (K, 2F) matmul in-kernel and split back by cheap XLA slices.
    sound_wcat = jnp.concatenate([params['sound_ws'], params['sound_wb']], axis=1)
    mod = frame_modulation(frames_all, params['frame_w'], params['frame_b'],
                           sound_wcat)                                # (N, B, 2F)
    scale, shift = mod[..., :Fq], mod[..., Fq:]

    outs = fused_spectral(mm, mags_all, scale, shift,
                          cycs=args.cycs_in_test,
                          binary_mask=args.binary_mask,
                          weighted_loss=args.weighted_loss)
    if args.weighted_loss:
        pred_all, gt_all, mm_eps, weight, loss_parts = outs
    else:
        pred_all, gt_all, mm_eps, loss_parts = outs
        weight = jnp.ones_like(mm_eps)

    numel = B * Fq * T
    loss_total = jnp.sum(loss_parts[:, 0, 0])     # per-B-tile partial sums
    err_mask = (loss_total / (N * numel)).reshape(1)

    outputs = {
        'pred_masks': [pred_all[n] for n in range(N)],
        'gt_masks': [gt_all[n] for n in range(N)],
        'mag_mix': mm_eps[:, None],      # restore channel dim (B, 1, F, T)
        'mags': mags,
        'weight': weight[:, None],
    }
    return err_mask, outputs


# ---------------------------------------------------------------------------
# Pure-JAX reference (same synthetic nets) for correctness checking
# ---------------------------------------------------------------------------
def _reference_forward(batch_data, params, args):
    mm = batch_data['mag_mix'][:, 0] + 1e-10
    N = args.num_mix
    weight = (jnp.clip(jnp.log(1.0 + mm), 0.001, 10.0)
              if args.weighted_loss else jnp.ones_like(mm))
    log_mm = jnp.log(mm)
    preds, gts, losses = [], [], []
    for n in range(N):
        fr = batch_data['frames'][n]
        pooled = jnp.mean(fr.reshape(fr.shape[0], fr.shape[1], -1), axis=-1)
        feat = jnp.maximum(pooled @ params['frame_w'] + params['frame_b'], 0.0)
        scale = feat @ params['sound_ws']
        shift = feat @ params['sound_wb']
        x = log_mm
        for _ in range(args.cycs_in_test):
            x = jnp.tanh(scale[:, :, None] * x + shift[:, :, None])
        pred = jax.nn.sigmoid(x)
        mg = batch_data['mags'][n][:, 0]
        if args.binary_mask:
            gt = (mg > 0.5 * mm).astype(jnp.float32)
            per = (jnp.maximum(x, 0.0) + jnp.log(1.0 + jnp.exp(-jnp.abs(x)))
                   - gt * x)
        else:
            gt = jnp.clip(mg / mm, 0.0, 5.0)
            per = jnp.abs(pred - gt)
        losses.append(jnp.sum(weight * per))
        preds.append(pred)
        gts.append(gt)
    err = (sum(losses) / (N * mm.size)).reshape(1)
    return err, preds, gts


if __name__ == "__main__":
    B, Fq, T = 2, 32, 128         # spectrogram: batch, freq bins, time frames
    N = 2                         # number of mixed sources
    C, Tf, H, W = 3, 4, 8, 8      # video frames (S = Tf*H*W = 256)
    K = 32                        # frame feature width

    args = SimpleNamespace(num_mix=N, log_freq=False, weighted_loss=True,
                           binary_mask=True, output_activation='sigmoid',
                           cycs_in_test=3)

    key = jax.random.PRNGKey(0)
    k = jax.random.split(key, 8)
    batch_data = {
        'mag_mix': jnp.abs(jax.random.normal(k[0], (B, 1, Fq, T), jnp.float32)),
        'mags': [jnp.abs(jax.random.normal(k[1 + n], (B, 1, Fq, T), jnp.float32))
                 for n in range(N)],
        'frames': [jax.random.normal(k[3 + n], (B, C, Tf, H, W), jnp.float32)
                   for n in range(N)],
    }
    params = {
        'frame_w': 0.1 * jax.random.normal(k[5], (C, K), jnp.float32),
        'frame_b': 0.1 * jax.random.normal(k[6], (1, K), jnp.float32),
        'sound_ws': 0.1 * jax.random.normal(k[7], (K, Fq), jnp.float32),
        'sound_wb': 0.05 * jnp.ones((K, Fq), jnp.float32),
    }

    err_mask, outputs = net_wrapper_forward(batch_data, params, args)
    jax.block_until_ready(err_mask)
    for p in outputs['pred_masks'] + outputs['gt_masks']:
        jax.block_until_ready(p)

    # shape / sanity checks
    assert err_mask.shape == (1,)
    assert outputs['pred_masks'][0].shape == (B, Fq, T)
    assert outputs['mag_mix'].shape == (B, 1, Fq, T)
    assert outputs['weight'].shape == (B, 1, Fq, T)
    assert bool(jnp.isfinite(err_mask).all())

    # correctness vs. pure-JAX reference
    err_ref, preds_ref, gts_ref = _reference_forward(batch_data, params, args)
    assert bool(jnp.allclose(err_mask, err_ref, rtol=2e-3, atol=2e-3))
    for n in range(N):
        assert bool(jnp.allclose(outputs['pred_masks'][n], preds_ref[n],
                                 atol=2e-3))
        assert bool(jnp.allclose(outputs['gt_masks'][n], gts_ref[n], atol=1e-5))

    print("KERNEL_OK")
</pallas_src>

<mosaic_0001>
module attributes {stable_mosaic.version = 11 : i64} {
  func.func @_frame_mod_kernel(%arg0: i32, %arg1: i32, %arg2: memref<1x2x3x256xf32, #tpu.memory_space<vmem>>, %arg3: memref<3x32xf32, #tpu.memory_space<vmem>>, %arg4: memref<1x32xf32, #tpu.memory_space<vmem>>, %arg5: memref<32x64xf32, #tpu.memory_space<vmem>>, %arg6: memref<1x2x64xf32, #tpu.memory_space<vmem>>, %arg7: memref<2x3xf32, #tpu.memory_space<vmem>>) attributes {dimension_semantics = [#tpu.dimension_semantics<parallel>, #tpu.dimension_semantics<arbitrary>], iteration_bounds = array<i64: 2, 1>, scalar_prefetch = 0 : i64, scratch_operands = 1 : i64, tpu.core_type = #tpu.core_type<tc>, window_params = [{transform_indices = @transform_0, window_bounds = array<i64: 1, 2, 3, 256>}, {pipeline_mode = #tpu.pipeline_mode<synchronous>, transform_indices = @transform_1, window_bounds = array<i64: 3, 32>}, {pipeline_mode = #tpu.pipeline_mode<synchronous>, transform_indices = @transform_2, window_bounds = array<i64: 1, 32>}, {pipeline_mode = #tpu.pipeline_mode<synchronous>, transform_indices = @transform_3, window_bounds = array<i64: 32, 64>}, {transform_indices = @transform_4, window_bounds = array<i64: 1, 2, 64>}]} {
    %c0_i32 = arith.constant 0 : i32
    %0 = arith.cmpi eq, %arg1, %c0_i32 : i32
    %1 = arith.extui %0 : i1 to i32
    %c0_i32_0 = arith.constant 0 : i32
    %2 = arith.cmpi ne, %1, %c0_i32_0 : i32
    scf.if %2 {
      %cst_10 = arith.constant 0.000000e+00 : f32
      %12 = vector.broadcast %cst_10 : f32 to vector<2x3xf32>
      %c0_11 = arith.constant 0 : index
      %c0_12 = arith.constant 0 : index
      %13 = vector.load %arg7[%c0_11, %c0_12] : memref<2x3xf32, #tpu.memory_space<vmem>>, vector<2x3xf32>
      tpu.vector_store %arg7[%c0_11, %c0_12], %12 {strides = array<i32>} : memref<2x3xf32, #tpu.memory_space<vmem>>, vector<2x3xf32>,
    } else {
    }
    %c0 = arith.constant 0 : index
    %c0_1 = arith.constant 0 : index
    %3 = vector.load %arg7[%c0, %c0_1] : memref<2x3xf32, #tpu.memory_space<vmem>>, vector<2x3xf32>
    %c0_2 = arith.constant 0 : index
    %c0_3 = arith.constant 0 : index
    %c0_4 = arith.constant 0 : index
    %c0_5 = arith.constant 0 : index
    %4 = vector.load %arg2[%c0_2, %c0_3, %c0_4, %c0_5] : memref<1x2x3x256xf32, #tpu.memory_space<vmem>>, vector<1x2x3x256xf32>
    %5 = vector.shape_cast %4 : vector<1x2x3x256xf32> to vector<2x3x256xf32>
    %cst = arith.constant dense<0.000000e+00> : vector<2x3xf32>
    %6 = vector.multi_reduction <add>, %5, %cst [2] : vector<2x3x256xf32> to vector<2x3xf32>
    %7 = arith.addf %3, %6 : vector<2x3xf32>
    %c0_6 = arith.constant 0 : index
    %c0_7 = arith.constant 0 : index
    %8 = vector.load %arg7[%c0_6, %c0_7] : memref<2x3xf32, #tpu.memory_space<vmem>>, vector<2x3xf32>
    tpu.vector_store %arg7[%c0_6, %c0_7], %7 {strides = array<i32>} : memref<2x3xf32, #tpu.memory_space<vmem>>, vector<2x3xf32>,
    %c0_i32_8 = arith.constant 0 : i32
    %9 = arith.cmpi eq, %arg1, %c0_i32_8 : i32
    %10 = arith.extui %9 : i1 to i32
    %c0_i32_9 = arith.constant 0 : i32
    %11 = arith.cmpi ne, %10, %c0_i32_9 : i32
    scf.if %11 {
      %c0_10 = arith.constant 0 : index
      %c0_11 = arith.constant 0 : index
      %12 = vector.load %arg7[%c0_10, %c0_11] : memref<2x3xf32, #tpu.memory_space<vmem>>, vector<2x3xf32>
      %cst_12 = arith.constant 3.906250e-03 : f32
      %13 = vector.broadcast %cst_12 : f32 to vector<2x3xf32>
      %14 = arith.mulf %12, %13 : vector<2x3xf32>
      %c0_13 = arith.constant 0 : index
      %c0_14 = arith.constant 0 : index
      %15 = vector.load %arg3[%c0_13, %c0_14] : memref<3x32xf32, #tpu.memory_space<vmem>>, vector<3x32xf32>
      %cst_15 = arith.constant dense<0.000000e+00> : vector<2x32xf32>
      %16 = tpu.matmul %14, %15, %cst_15 {dimension_numbers = #tpu.dot_dimension_numbers<[1], [0], [0], [1], [0, 0, 1, 1], [], []>} : vector<2x3xf32>, vector<3x32xf32>, vector<2x32xf32> -> vector<2x32xf32>
      %c0_16 = arith.constant 0 : index
      %c0_17 = arith.constant 0 : index
      %17 = vector.load %arg4[%c0_16, %c0_17] : memref<1x32xf32, #tpu.memory_space<vmem>>, vector<1x32xf32>
      %18 = vector.broadcast %17 : vector<1x32xf32> to vector<2x32xf32>
      %19 = arith.addf %16, %18 : vector<2x32xf32>
      %cst_18 = arith.constant 0.000000e+00 : f32
      %20 = vector.broadcast %cst_18 : f32 to vector<2x32xf32>
      %21 = arith.maximumf %19, %20 : vector<2x32xf32>
      %c0_19 = arith.constant 0 : index
      %c0_20 = arith.constant 0 : index
      %22 = vector.load %arg5[%c0_19, %c0_20] : memref<32x64xf32, #tpu.memory_space<vmem>>, vector<32x64xf32>
      %cst_21 = arith.constant dense<0.000000e+00> : vector<2x64xf32>
      %23 = tpu.matmul %21, %22, %cst_21 {dimension_numbers = #tpu.dot_dimension_numbers<[1], [0], [0], [1], [0, 0, 1, 1], [], []>} : vector<2x32xf32>, vector<32x64xf32>, vector<2x64xf32> -> vector<2x64xf32>
      %c0_22 = arith.constant 0 : index
      %c0_23 = arith.constant 0 : index
      %c0_24 = arith.constant 0 : index
      %24 = vector.load %arg6[%c0_22, %c0_23, %c0_24] : memref<1x2x64xf32, #tpu.memory_space<vmem>>, vector<1x2x64xf32>
      %25 = vector.shape_cast %24 : vector<1x2x64xf32> to vector<2x64xf32>
      %26 = vector.shape_cast %23 : vector<2x64xf32> to vector<1x2x64xf32>
      tpu.vector_store %arg6[%c0_22, %c0_23, %c0_24], %26 {strides = array<i32>} : memref<1x2x64xf32, #tpu.memory_space<vmem>>, vector<1x2x64xf32>,
    } else {
    }
    return
  }
  func.func @transform_0(%arg0: i32, %arg1: i32) -> (i32, i32, i32, i32) {
    %c0_i32 = arith.constant 0 : i32
    %c0_i32_0 = arith.constant 0 : i32
    %c0_i32_1 = arith.constant 0 : i32
    return %arg0, %c0_i32, %c0_i32_0, %arg1 : i32, i32, i32, i32
  }
  func.func @transform_1(%arg0: i32, %arg1: i32) -> (i32, i32) {
    %c0_i32 = arith.constant 0 : i32
    %c0_i32_0 = arith.constant 0 : i32
    %c0_i32_1 = arith.constant 0 : i32
    return %c0_i32, %c0_i32_0 : i32, i32
  }
  func.func @transform_2(%arg0: i32, %arg1: i32) -> (i32, i32) {
    %c0_i32 = arith.constant 0 : i32
    %c0_i32_0 = arith.constant 0 : i32
    %c0_i32_1 = arith.constant 0 : i32
    return %c0_i32, %c0_i32_0 : i32, i32
  }
  func.func @transform_3(%arg0: i32, %arg1: i32) -> (i32, i32) {
    %c0_i32 = arith.constant 0 : i32
    %c0_i32_0 = arith.constant 0 : i32
    %c0_i32_1 = arith.constant 0 : i32
    return %c0_i32, %c0_i32_0 : i32, i32
  }
  func.func @transform_4(%arg0: i32, %arg1: i32) -> (i32, i32, i32) {
    %c0_i32 = arith.constant 0 : i32
    %c0_i32_0 = arith.constant 0 : i32
    %c0_i32_1 = arith.constant 0 : i32
    return %arg0, %c0_i32, %c0_i32_0 : i32, i32, i32
  }
}

</mosaic_0001>

<bundles_post_ra>
// kernel: tpu_custom_call.1
= control target key start
LH: loop header
LB: loop body
LE: loop exit
PB: predicated region body
PF: predicated region fallthrough
CT: control target
= control target key end

     0   :  { %9 = vsyncpa [#allocation4], 0  ;;  %s867_s0 = inlined_call_operand.vmem [shape: f32[2,2,3,256], index: 0, kind: input, shape index: {}]   ;;  %s868_s1 = inlined_call_operand.vmem [shape: f32[3,32], index: 1, kind: input, shape index: {}]   ;;  %s869_s2 = inlined_call_operand.vmem [shape: f32[1,32], index: 2, kind: input, shape index: {}]   ;;  %s870_s3 = inlined_call_operand.vmem [shape: f32[32,64], index: 3, kind: input, shape index: {}]   ;;  %s871_s4 = inlined_call_operand.hbm [shape: f32[2,2,64], index: 4, kind: output, shape index: {}]  }
   0x1   :  { %11 = vsyncpa [#allocation4 + $0x1], 0  ;;  %s731_s15 = smov 0   ;;  %s733_s16 = smov 0  }
   0x2   :  { %s735_s17 = smov 0   ;;  %s737_s18 = smov 0  }
   0x3   :  { %s739_s19 = smov 0   ;;  %s741_s20 = smov 0  }
   0x4 LB: > { %s526_s21 = sadd.s32 4294967295, %s701_s20   ;;  %s527_s22 = sadd.s32 4294967294, %s701_s20   ;;  %s701_s20 = sphi %s741_s20, %s17_s20   ;;  %s697_s19 = sphi %s739_s19, %s878_s19   ;;  %s693_s18 = sphi %s737_s18, %s877_s18   ;;  %s689_s17 = sphi %s735_s17, %s876_s17   ;;  %s685_s16 = sphi %s733_s16, %s875_s16   ;;  %s681_s15 = sphi %s731_s15, %s874_s15  }
   0x5   : > { %s29_s23 = sadd.s32 1, %s697_s19  ;;  %s127_s24 = sadd.s32 1, %s689_s17 }
   0x6   : > { %p31_p0 = scmp.ge.s32.totalorder %s29_s23, 2  ;;  %p137_p1 = scmp.ne.s32.totalorder %s689_s17, %s685_s16 }
   0x7   : > { %p138_p2 = scmp.eq.s32.totalorder %s526_s21, 1  ;;  %p143_p3 = scmp.ne.s32.totalorder %s685_s16, %s681_s15 }
   0x8   : > { %s880_s23 = smov (%p31_p0, %s29_s23), 0  ;;  %p144_p5 = scmp.eq.s32.totalorder %s527_s22, 1 }
   0x9   : > { %p771_p4 = por %p138_p2, %p137_p1  ;;  %s124_s26 = ssub.s32 %s697_s19, %s880_s23 }
   0xa   : > { %p530_p6 = scmp.ge.s32.totalorder %s701_s20, 1  ;;  %p125_p7 = scmp.eq.s32.totalorder %s124_s26, 0 }
   0xb   : > { %p778_p8 = por %p144_p5, %p143_p3  ;;  %p184_p9 = scmp.lt.s32.totalorder %s701_s20, 3 }
   0xc   : > { %s784_s28 = scalar_select %p125_p7, %s689_s17, %s127_s24  }
   0xd   : > { %p185_p10 = pnand %p530_p6, %p184_p9 }
   0xe   : > { %p215_p11 = scmp.lt.s32.totalorder (!%p185_p10), %s693_s18, 1  ;;  %s539_s6 = sshll.u32 (!%p185_p10), %s693_s18, 5 }
   0xf   : > { %188 = sbr.rel (%p185_p10) target bundleno = 591 (0x24f), region = 36  ;;  %s821_s11 = scalar_lea.hbm (!%p185_p10), %s871_s4, %s539_s6 }
  0x14   : > { %s216_s29 = scalar_select %p215_p11, %s693_s18, 1  ;;  %vm239_vm0 = vcmask 1042432   ;;  %vm228_vm1 = vcmask 17408   ;;  %v703_v10 = vmov 0.0   ;;  %v273_v11 = vld [vmem:[%s868_s1] sm:$0x7]  ;;  %v252_v13 = vlaneseq }
  0x15   : > { %229 = vst.msk [vmem:[#allocation2] sm:$0x3] %vm228_vm1, %v703_v10  ;;  %550 = vmatprep.subr.mxu0 %v703_v10  ;;  %555 = vmatprep.subr.mxu1 %v703_v10  ;;  %vm704_vm2 = vmmov 0   ;;  %v362_v12 = vld [vmem:[%s870_s3 + $0x18] sm:$0xff]  ;;  %vm262_vm3 = vcmask 1041409   ;;  %vm281_vm4 = vcmask 23552  }
  0x16   : > { %s542_s30 = sshll.u32 %s216_s29, 4  ;;  %551 = vmatpush3.msk.msra.mxu0 %vm239_vm0, %v273_v11  ;;  %552 = vmatprep.mubr.msk.f32.mxu0 %vm704_vm2, %v703_v10  ;;  %v253_v14 = vand.u32 127, %v252_v13  ;;  %v255_v15 = vshrl.u32 %v252_v13, 7  ;;  %v361_v26 = vld [vmem:[%s870_s3 + $0x10] sm:$0xff]  ;;  %v360_v27 = vld [vmem:[%s870_s3 + $0x8] sm:$0xff]  ;;  %v359_v28 = vld [vmem:[%s870_s3] sm:$0xff] }
  0x17   : > { %s222_s7 = scalar_lea.vmem %s867_s0, %s542_s30  ;;  %563 = vmatprep.mubr.msk.f32.mxu1 %vm704_vm2, %v703_v10  ;;  %556 = vmatpush3.msra.mxu1 %v362_v12  ;;  %v534_v29 = vld [vmem:[%s869_s2] ss:$0 sm:$0xff]  ;;  %vm363_vm5 = vcmask 261120   ;;  %s211_s30 = sand.u32 1, %s685_s16   ;;  %vm437_vm6 = vcmask 517120  }
  0x18   : > { %v231_v0 = vld [vmem:[%s222_s7] sm:$0x77]  ;;  %v232_v1 = vld [vmem:[%s222_s7 + $0x8] sm:$0x77]  ;;  %557 = vmatprep.subr.mxu1 %v703_v10  ;;  %v256_v17 = vsub.s32 %v253_v14, %v255_v15  ;;  %s531_s5 = sshll.u32 %s211_s30, 1  ;;  %s440_s12 = scalar_lea.sflag [#allocation4], %s211_s30 }
  0x19   : > { %v235_v2 = vcombine.high %v231_v0, %v231_v0  ;;  %v240_v3 = vsel %vm239_vm0, %v231_v0, 0.0  ;;  %v236_v4 = vcombine.high %v232_v1, %v232_v1  ;;  %v245_v6 = vsel %vm239_vm0, %v232_v1, 0.0  ;;  %558 = vmatpush3.msra.mxu1 %v361_v26  ;;  %s213_s7 = scalar_lea.vmem [#allocation3], %s531_s5  ;;  %s705_s18 = smov [#allocation3]  }
  0x1a   : > { %559 = vmatprep.subr.mxu1 %v703_v10  ;;  %s453_s8 = sshll.u32 %s213_s7, 4  ;;  %s629_s14 = sshll.u32 %s705_s18, 4  ;;  %s823_s8 = int_to_ptr.vmem [resolvable:$true] %s453_s8  ;;  %s630_s14 = int_to_ptr.vmem [resolvable:$false] %s629_s14 }
  0x1b   : > { %v241_v5 = vsel %vm239_vm0, %v235_v2, 0.0  ;;  %v246_v7 = vsel %vm239_vm0, %v236_v4, 0.0  ;;  %560 = vmatpush3.msra.mxu1 %v360_v27  ;;  %s625_s13 = scalar_lea.vmem %s823_s8, 32  ;;  %s631_s21 = scalar_lea.vmem %s630_s14, 64 }
  0x1c   : > { %v242_v8 = vadd.f32 %v241_v5, %v240_v3  ;;  %v247_v9 = vadd.f32 %v246_v7, %v245_v6  ;;  %v230_v20 = vld [vmem:[#allocation2] sm:$0x3]  ;;  %561 = vmatprep.subr.mxu1 %v703_v10  ;;  %p626_p12 = scmp.ne.s32.totalorder %s823_s8, %s625_s13  ;;  %p632_p1 = scmp.lt.s32.totalorder %s823_s8, %s630_s14 }
  0x1d   : > { %562 = vmatpush3.msra.mxu1 %v359_v28  ;;  %p633_p2 = scmp.lt.s32.totalorder %s631_s21, %s625_s13 }
  0x1e   : > { %243 = vadd.xlane.f32.xlu0 %v242_v8  ;;  %p627_p13 = pnand %p626_p12, %p771_p4 }
  0x1f   : > { %p634_p3 = por %p633_p2, %p632_p1 }
  0x20   : > { %p628_p0 = pneg %p627_p13 }
  0x22   : > { %248 = vadd.xlane.f32.xlu0 %v247_v9  ;;  %p635_p5 = pnand %p634_p3, %p628_p0 }
  0xa7   : > { %v244_v16 = vpop.xlane.xlu0 %243 }
  0xa8   : > { %v257_v19 = vrot.slane %v244_v16, %v256_v17 }
  0xab   : > { %v249_v18 = vpop.xlane.xlu0 %248 }
  0xac   : > { %v261_v21 = vrot.slane %v249_v18, %v256_v17 }
  0xae   : > { %v263_v22 = vsel %vm262_vm3, %v261_v21, %v257_v19 }
  0xaf   : > { %v265_v23 = vadd.f32 %v263_v22, %v230_v20 }
  0xb1   : > { %267 = vst.msk [vmem:[#allocation2] sm:$0x3] %vm228_vm1, %v265_v23 }
  0xb8   : > { %v271_v24 = vld [vmem:[#allocation2] sm:$0x3] }
  0xb9   : > { %v272_v25 = vmul.f32 0.00390625, %v271_v24 }
  0xbb   : > { %553 = vmatmul.mubr.msk.f32.vlgmr.msra.gmra.mxu0 %vm281_vm4, %v272_v25 }
 0x17b   : > { %v354_v30 = vpop.f32.mrf.mxu0 }
 0x17c   : > { %v355_v31 = vadd.f32 %v534_v29, %v354_v30 }
 0x17d   : > { %v554_v32 = vpop.f32.mrf.mxu0 }
 0x17e   : > { %v358_v33 = vmax.f32 %v355_v31, 0.0 }
 0x180   : > { %564 = vmatmul.mubr.msk.f32.vlgmr.msra.gmra.mxu1 %vm363_vm5, %v358_v33 }
 0x240   : > { %v433_v34 = vpop.f32.mrf.mxu1 }
 0x241   : > { %438 = vst.msk [vmem:[%s213_s7] sm:$0x3] %vm437_vm6, %v433_v34 }
 0x242   : > { %v565_v35 = vpop.f32.mrf.mxu1 }
 0x243   : > { %638 = shalt.err (!%p635_p5)
}
 0x244   : > { %s639_s22 = scalar_lea.hbm %s821_s11, 32  ;;  %s643_s29 = scalar_lea.hbm %s871_s4, 64 }
 0x245   : > { %p640_p6 = scmp.ne.s32.totalorder %s821_s11, %s639_s22  ;;  %p644_p10 = scmp.lt.s32.totalorder %s821_s11, %s871_s4 }
 0x246   : > { %p645_p11 = scmp.lt.s32.totalorder %s643_s29, %s639_s22 }
 0x247   : > { %p641_p7 = pnand %p640_p6, %p771_p4 }
 0x248   : > { %p646_p12 = por %p645_p11, %p644_p10 }
 0x249   : > { %p642_p9 = pneg %p641_p7 }
 0x24b   : > { %p647_p13 = pnand %p646_p12, %p642_p9 }
 0x24d   : > { %650 = shalt.err (!%p647_p13)
}
 0x24e   : > { %566 = dma.vmem_to_hbm [thread:$0]  (%p771_p4), %s823_s8, 32, %s821_s11, %s440_s12  }
 0x24f PF: > { %p572_p0 = scmp.ge.s32.totalorder %s701_s20, 2  ;;  %s465_s6 = sand.u32 1, %s681_s15  }
 0x250   : > { %s466_s7 = scalar_lea.sflag [#allocation4], %s465_s6 }
 0x251   : > { %p569_p1 = pnand %p572_p0, %p778_p8 }
 0x253   : > { %p570_p2 = pneg %p569_p1 }
 0x255   : > { %676 = dma.done.wait (%p570_p2), %s466_s7, 32  }
 0x256   : > { %678 = vsyncadd (%p570_p2), %s466_s7, 4294967264  ;;  %s17_s20 = sadd.s32 1, %s701_s20   ;;  %s874_s15 = smov %s685_s16 }
 0x257   : > { %p14_p3 = scmp.ge.s32.totalorder %s17_s20, 4   ;;  %s875_s16 = smov %s689_s17 }
 0x258   : > { %s876_s17 = smov %s784_s28  ;;  %s877_s18 = smov %s697_s19 }
 0x259   : > { %s878_s19 = smov %s880_s23  ;;  %16 = sbr.rel (!%p14_p3) target bundleno = 4 (0x4), region = 79 }
 0x25e   :  { %471 = vsyncpa [#allocation4], 1 }
 0x25f   :  { %473 = vsyncpa [#allocation4 + $0x1], 1 }

</bundles_post_ra>
